<compile_context>
chip_gen: v7x
topology: tpu7x:2x2x1
jax: 0.10.0
libtpu: 0.0.40
codegen_flags: <defaults>
</compile_context>

<pallas_src>
import functools

import jax
import jax.numpy as jnp
from jax.experimental import pallas as pl
from jax.experimental.pallas import tpu as pltpu


def _round_up(x: int, m: int) -> int:
    return ((x + m - 1) // m) * m


def _cdiv(a: int, b: int) -> int:
    return -(-a // b)


@functools.lru_cache(maxsize=1)
def _device_kind() -> str:
    try:
        return jax.devices()[0].device_kind.lower()
    except Exception:
        return ""


@functools.lru_cache(maxsize=1)
def _physical_vmem_bytes() -> int:
    try:
        info = pltpu.get_tpu_info()
        v = int(getattr(info, "vmem_capacity_bytes", 0) or 0)
        if v > 0:
            return v
    except Exception:
        pass
    kind = _device_kind()
    if any(t in kind for t in ("v7", "7x", "tpu7")):
        return 64 * 1024 * 1024
    if any(t in kind for t in ("v5", "v6")):
        return 128 * 1024 * 1024
    return 64 * 1024 * 1024  # conservative default


@functools.lru_cache(maxsize=1)
def _num_tensorcores() -> int:
    kind = _device_kind()
    return 2 if any(t in kind for t in ("v7", "7x", "tpu7")) else 1


# --------------------------------------------------------------------------
# Kernels
# --------------------------------------------------------------------------
def _mlp_kernel_single(x_ref, w_in_ref, b_in_ref, w_out_ref, b_out_ref, o_ref,
                       *, act_fn, compute_dtype):
    """Whole d_mlp fits in one chunk: no accumulator, direct output write."""
    # TODO(synk): for transcendental act_fns with tiny d_model, split `mid`
    # into column sub-chunks so EUP activation overlaps the second matmul.
    mid = act_fn(
        jnp.dot(x_ref[...], w_in_ref[...], preferred_element_type=jnp.float32)
        + b_in_ref[...]
    )
    out = jnp.dot(mid.astype(compute_dtype), w_out_ref[...],
                  preferred_element_type=jnp.float32) + b_out_ref[...]
    o_ref[...] = out.astype(o_ref.dtype)


def _mlp_kernel_chunked(x_ref, w_in_ref, b_in_ref, w_out_ref, b_out_ref, o_ref,
                        acc_ref, *, act_fn, compute_dtype):
    """d_mlp is chunked along grid axis 1 with an f32 VMEM accumulator."""
    k = pl.program_id(1)

    mid = act_fn(
        jnp.dot(x_ref[...], w_in_ref[...], preferred_element_type=jnp.float32)
        + b_in_ref[...]
    )
    contrib = jnp.dot(mid.astype(compute_dtype), w_out_ref[...],
                      preferred_element_type=jnp.float32)

    @pl.when(k == 0)
    def _first():
        # Fold the output bias into the first chunk: no zero-fill pass.
        acc_ref[...] = contrib + b_out_ref[...]

    @pl.when(k > 0)
    def _accum():
        acc_ref[...] += contrib

    @pl.when(k == pl.num_programs(1) - 1)
    def _finalize():
        o_ref[...] = acc_ref[...].astype(o_ref.dtype)


# --------------------------------------------------------------------------
# Forward on pre-padded parameters
# --------------------------------------------------------------------------
@functools.partial(
    jax.jit, static_argnames=("act_fn", "tile_m", "chunk", "compute_dtype"))
def _mlp_forward_padded(x, w_in_p, b_in_p, w_out_p, b_out_p, *,
                        act_fn, tile_m, chunk, compute_dtype):
    orig_shape = x.shape
    out_dtype = x.dtype
    d_model = orig_shape[-1]
    d_model_p = w_out_p.shape[1]
    d_mlp_p = w_in_p.shape[1]
    n_k = d_mlp_p // chunk

    cdt = jnp.dtype(compute_dtype)
    cbytes = cdt.itemsize
    obytes = jnp.dtype(out_dtype).itemsize

    x2 = x.reshape(-1, d_model)
    m = x2.shape[0]

    # --- Row tile selection: large (amortize ~0.35us/step + weight
    # re-streaming), 16-aligned (bf16 sublane packing), split across both
    # TensorCores on v7x when possible, balanced to avoid wasted pad tiles.
    row_align = 16
    tile_m_eff = max(row_align,
                     min(_round_up(tile_m, row_align), _round_up(m, row_align)))
    if _num_tensorcores() >= 2 and m >= 2 * row_align:
        tile_m_eff = min(tile_m_eff, _round_up(_cdiv(m, 2), row_align))

    def vmem_est(tm):
        wbufs = 1 if n_k == 1 else 2
        est = (2 * tm * d_model_p * cbytes            # x tile (double-buffered)
               + 2 * tm * d_model_p * obytes          # out tile (double-buffered)
               + wbufs * d_model_p * chunk * cbytes * 2   # W_in / W_out chunks
               + wbufs * 8 * (chunk + d_model_p) * 4      # biases (f32, sublane pad)
               + tm * chunk * (4 + cbytes))               # mid (f32) + bf16 copy
        if n_k > 1:
            est += tm * d_model_p * 4                  # f32 accumulator scratch
        return est

    # Physical-VMEM-aware budget: ~85% of 64 MiB on v7x, ~85% of 128 MiB on
    # v5e/v6e. Shrink the row tile until the estimate fits.
    vmem_cap = int(_physical_vmem_bytes() * 0.85)
    while vmem_est(tile_m_eff) * 5 // 4 > vmem_cap and tile_m_eff > 2 * row_align:
        tile_m_eff = max(row_align, _round_up(tile_m_eff // 2, row_align))

    # Balance row tiles (m=300 w/ tile 256 -> two 160-row tiles, not 256+pad).
    n_i = _cdiv(m, tile_m_eff)
    tile_m_eff = _round_up(_cdiv(m, n_i), row_align)
    n_i = _cdiv(m, tile_m_eff)
    m_p = n_i * tile_m_eff

    vmem_limit = int(min(max(vmem_est(tile_m_eff) * 5 // 4, 32 * 1024 * 1024),
                         vmem_cap))

    # Pad / cast x only if actually needed (skip the extra HBM pass otherwise).
    if m_p != m or d_model_p != d_model:
        xp = jnp.zeros((m_p, d_model_p), cdt).at[:m, :d_model].set(
            x2.astype(cdt))
    else:
        xp = x2.astype(cdt)

    def resident(shape, index_map):
        # Constant-index params: single VMEM buffer (no pointless 2x residency).
        return pl.BlockSpec(shape, index_map,
                            pipeline_mode=pl.Buffered(buffer_count=1))

    if n_k == 1:
        kernel = functools.partial(_mlp_kernel_single, act_fn=act_fn,
                                   compute_dtype=cdt)
        grid_spec = pltpu.PrefetchScalarGridSpec(
            num_scalar_prefetch=0,
            grid=(n_i,),
            in_specs=[
                pl.BlockSpec((tile_m_eff, d_model_p), lambda i: (i, 0)),
                resident((d_model_p, chunk), lambda i: (0, 0)),
                resident((1, chunk), lambda i: (0, 0)),
                resident((chunk, d_model_p), lambda i: (0, 0)),
                resident((1, d_model_p), lambda i: (0, 0)),
            ],
            out_specs=pl.BlockSpec((tile_m_eff, d_model_p), lambda i: (i, 0)),
        )
        dims = ("parallel",)
    else:
        kernel = functools.partial(_mlp_kernel_chunked, act_fn=act_fn,
                                   compute_dtype=cdt)
        grid_spec = pltpu.PrefetchScalarGridSpec(
            num_scalar_prefetch=0,
            grid=(n_i, n_k),
            in_specs=[
                pl.BlockSpec((tile_m_eff, d_model_p), lambda i, k: (i, 0)),
                pl.BlockSpec((d_model_p, chunk), lambda i, k: (0, k)),
                pl.BlockSpec((1, chunk), lambda i, k: (0, k)),
                pl.BlockSpec((chunk, d_model_p), lambda i, k: (k, 0)),
                resident((1, d_model_p), lambda i, k: (0, 0)),
            ],
            out_specs=pl.BlockSpec((tile_m_eff, d_model_p), lambda i, k: (i, 0)),
            scratch_shapes=[pltpu.VMEM((tile_m_eff, d_model_p), jnp.float32)],
        )
        dims = ("parallel", "arbitrary")

    out = pl.pallas_call(
        kernel,
        out_shape=jax.ShapeDtypeStruct((m_p, d_model_p), out_dtype),
        grid_spec=grid_spec,
        compiler_params=pltpu.CompilerParams(
            dimension_semantics=dims,
            vmem_limit_bytes=vmem_limit,
        ),
    )(xp, w_in_p, b_in_p, w_out_p, b_out_p)

    return out[:m, :d_model].reshape(orig_shape)


# --------------------------------------------------------------------------
# User-facing module: pads/casts weights ONCE, then reuses them every call.
# --------------------------------------------------------------------------
def _pad_cast_2d(a, rows, cols, dtype):
    a = jnp.asarray(a)
    if a.shape == (rows, cols) and a.dtype == jnp.dtype(dtype):
        return a
    out = jnp.zeros((rows, cols), dtype)
    return out.at[:a.shape[0], :a.shape[1]].set(a.astype(dtype))


class PallasMLP:
    """y = act_fn(x @ w_in_t + b_in) @ w_out_t + b_out  (fused Pallas kernel).

    w_in_t  = mlp_in.weight.T   [d_model, d_mlp]
    w_out_t = mlp_out.weight.T  [d_mlp, d_model]
    b_in / b_out may be None (in_bias / out_bias = False).
    """

    def __init__(self, w_in_t, b_in, w_out_t, b_out, *, act_fn=jax.nn.relu,
                 tile_m=512, d_mlp_chunk=512, compute_dtype=jnp.bfloat16):
        # TODO(synk): act_fn must be a trace-time JAX callable (the PyTorch
        # module takes an arbitrary runtime torch callable).
        w_in_t = jnp.asarray(w_in_t)
        w_out_t = jnp.asarray(w_out_t)
        d_model, d_mlp = w_in_t.shape
        assert w_out_t.shape == (d_mlp, d_model)
        self.d_model, self.d_mlp = d_model, d_mlp
        self.act_fn = act_fn
        self.tile_m = int(tile_m)
        self.compute_dtype = jnp.dtype(compute_dtype)

        d_model_p = _round_up(d_model, 128)
        # d_mlp chunking: target rounded to 256 (v6e/v7x MXU is 2x256^2), then
        # balanced across chunks so d_mlp padding waste stays small.
        d_mlp_128 = _round_up(d_mlp, 128)
        chunk = min(_round_up(max(int(d_mlp_chunk), 128), 256), d_mlp_128)
        n_k = _cdiv(d_mlp_128, chunk)
        chunk = _round_up(_cdiv(d_mlp_128, n_k), 128)
        d_mlp_p = n_k * chunk
        self.chunk = chunk

        if b_in is None:
            b_in = jnp.zeros((d_mlp,), jnp.float32)
        if b_out is None:
            b_out = jnp.zeros((d_model,), jnp.float32)
        b_in = jnp.asarray(b_in)
        b_out = jnp.asarray(b_out)

        cdt = self.compute_dtype
        # Padding rows of w_out_p with exact zeros keeps d_mlp padding correct
        # even for activations with act(0) != 0.
        self.w_in_p = _pad_cast_2d(w_in_t, d_model_p, d_mlp_p, cdt)
        self.w_out_p = _pad_cast_2d(w_out_t, d_mlp_p, d_model_p, cdt)
        self.b_in_p = _pad_cast_2d(b_in.reshape(1, -1), 1, d_mlp_p, jnp.float32)
        self.b_out_p = _pad_cast_2d(b_out.reshape(1, -1), 1, d_model_p,
                                    jnp.float32)

    def __call__(self, x):
        return _mlp_forward_padded(
            x, self.w_in_p, self.b_in_p, self.w_out_p, self.b_out_p,
            act_fn=self.act_fn, tile_m=self.tile_m, chunk=self.chunk,
            compute_dtype=self.compute_dtype)


# --------------------------------------------------------------------------
# Reference + init helpers
# --------------------------------------------------------------------------
def init_params(key, d_model, d_mlp, dtype=jnp.float32):
    """Mimics nn.Linear default init: U(-1/sqrt(fan_in), +1/sqrt(fan_in))."""
    k1, k2, k3, k4 = jax.random.split(key, 4)
    lim_in = 1.0 / float(d_model) ** 0.5
    lim_out = 1.0 / float(d_mlp) ** 0.5
    # Stored already transposed relative to nn.Linear.weight ([out, in]).
    w_in_t = jax.random.uniform(k1, (d_model, d_mlp), dtype, -lim_in, lim_in)
    b_in = jax.random.uniform(k2, (d_mlp,), dtype, -lim_in, lim_in)
    w_out_t = jax.random.uniform(k3, (d_mlp, d_model), dtype, -lim_out, lim_out)
    b_out = jax.random.uniform(k4, (d_model,), dtype, -lim_out, lim_out)
    return w_in_t, b_in, w_out_t, b_out


def mlp_ref(x, w_in_t, b_in, w_out_t, b_out, act_fn=jax.nn.relu):
    mid = x @ w_in_t
    if b_in is not None:
        mid = mid + b_in
    mid = act_fn(mid)
    out = mid @ w_out_t
    if b_out is not None:
        out = out + b_out
    return out


if __name__ == "__main__":
    key = jax.random.PRNGKey(0)
    kx1, kp1, kx2, kp2, kx3, kp3 = jax.random.split(key, 6)

    # Case 1: toy shapes — single d_mlp chunk, resident (single-buffered)
    # weights, direct-output kernel (no accumulator scratch).
    d_model, d_mlp = 64, 128
    x1 = jax.random.normal(kx1, (2, 8, d_model), jnp.float32)
    p1 = init_params(kp1, d_model, d_mlp)
    mlp1 = PallasMLP(*p1)
    out1 = jax.block_until_ready(mlp1(x1))
    ref1 = mlp_ref(x1, *p1)
    assert out1.shape == x1.shape and out1.dtype == x1.dtype
    assert jnp.allclose(out1, ref1, atol=5e-2, rtol=5e-2), (
        float(jnp.max(jnp.abs(out1 - ref1))))

    # Case 2: chunked d_mlp accumulation (n_k = 3), several row tiles,
    # transcendental activation (GELU), d_model padding path.
    d_model2, d_mlp2 = 64, 768
    x2 = jax.random.normal(kx2, (4, 96, d_model2), jnp.float32)
    p2 = init_params(kp2, d_model2, d_mlp2)
    mlp2 = PallasMLP(*p2, act_fn=jax.nn.gelu, tile_m=128, d_mlp_chunk=256)
    out2 = jax.block_until_ready(mlp2(x2))
    ref2 = mlp_ref(x2, *p2, act_fn=jax.nn.gelu)
    assert out2.shape == x2.shape
    assert jnp.allclose(out2, ref2, atol=5e-2, rtol=5e-2), (
        float(jnp.max(jnp.abs(out2 - ref2))))

    # Case 3: already lane-aligned d_model (no x padding / no row padding) and
    # in_bias=False, multiple row tiles with single d_mlp chunk.
    d_model3, d_mlp3 = 128, 256
    x3 = jax.random.normal(kx3, (2, 64, d_model3), jnp.float32)
    w_in3, _, w_out3, b_out3 = init_params(kp3, d_model3, d_mlp3)
    mlp3 = PallasMLP(w_in3, None, w_out3, b_out3, tile_m=64)
    out3 = jax.block_until_ready(mlp3(x3))
    ref3 = mlp_ref(x3, w_in3, None, w_out3, b_out3)
    assert out3.shape == x3.shape
    assert jnp.allclose(out3, ref3, atol=5e-2, rtol=5e-2), (
        float(jnp.max(jnp.abs(out3 - ref3))))

    print("KERNEL_OK")
</pallas_src>

<mosaic_0001>
module attributes {stable_mosaic.version = 11 : i64} {
  func.func @_mlp_kernel_single(%arg0: i32, %arg1: memref<16x128xbf16, #tpu.memory_space<vmem>>, %arg2: memref<128x128xbf16, #tpu.memory_space<vmem>>, %arg3: memref<1x128xf32, #tpu.memory_space<vmem>>, %arg4: memref<128x128xbf16, #tpu.memory_space<vmem>>, %arg5: memref<1x128xf32, #tpu.memory_space<vmem>>, %arg6: memref<16x128xf32, #tpu.memory_space<vmem>>) attributes {dimension_semantics = [#tpu.dimension_semantics<parallel>], iteration_bounds = array<i64: 1>, scalar_prefetch = 0 : i64, scratch_operands = 0 : i64, tpu.core_type = #tpu.core_type<tc>, window_params = [{transform_indices = @transform_0, window_bounds = array<i64: 16, 128>}, {pipeline_mode = #tpu.pipeline_mode<synchronous>, transform_indices = @transform_1, window_bounds = array<i64: 128, 128>}, {pipeline_mode = #tpu.pipeline_mode<synchronous>, transform_indices = @transform_2, window_bounds = array<i64: 1, 128>}, {pipeline_mode = #tpu.pipeline_mode<synchronous>, transform_indices = @transform_3, window_bounds = array<i64: 128, 128>}, {pipeline_mode = #tpu.pipeline_mode<synchronous>, transform_indices = @transform_4, window_bounds = array<i64: 1, 128>}, {transform_indices = @transform_5, window_bounds = array<i64: 16, 128>}]} {
    %c0 = arith.constant 0 : index
    %c0_0 = arith.constant 0 : index
    %0 = vector.load %arg1[%c0, %c0_0] : memref<16x128xbf16, #tpu.memory_space<vmem>>, vector<16x128xbf16>
    %c0_1 = arith.constant 0 : index
    %c0_2 = arith.constant 0 : index
    %1 = vector.load %arg2[%c0_1, %c0_2] : memref<128x128xbf16, #tpu.memory_space<vmem>>, vector<128x128xbf16>
    %cst = arith.constant dense<0.000000e+00> : vector<16x128xf32>
    %2 = tpu.matmul %0, %1, %cst {dimension_numbers = #tpu.dot_dimension_numbers<[1], [0], [0], [1], [0, 0, 1, 1], [], []>} : vector<16x128xbf16>, vector<128x128xbf16>, vector<16x128xf32> -> vector<16x128xf32>
    %c0_3 = arith.constant 0 : index
    %c0_4 = arith.constant 0 : index
    %3 = vector.load %arg3[%c0_3, %c0_4] : memref<1x128xf32, #tpu.memory_space<vmem>>, vector<1x128xf32>
    %4 = vector.broadcast %3 : vector<1x128xf32> to vector<16x128xf32>
    %5 = arith.addf %2, %4 : vector<16x128xf32>
    %cst_5 = arith.constant 0.000000e+00 : f32
    %6 = vector.broadcast %cst_5 : f32 to vector<16x128xf32>
    %7 = arith.maximumf %5, %6 : vector<16x128xf32>
    %8 = arith.truncf %7 : vector<16x128xf32> to vector<16x128xbf16>
    %c0_6 = arith.constant 0 : index
    %c0_7 = arith.constant 0 : index
    %9 = vector.load %arg4[%c0_6, %c0_7] : memref<128x128xbf16, #tpu.memory_space<vmem>>, vector<128x128xbf16>
    %cst_8 = arith.constant dense<0.000000e+00> : vector<16x128xf32>
    %10 = tpu.matmul %8, %9, %cst_8 {dimension_numbers = #tpu.dot_dimension_numbers<[1], [0], [0], [1], [0, 0, 1, 1], [], []>} : vector<16x128xbf16>, vector<128x128xbf16>, vector<16x128xf32> -> vector<16x128xf32>
    %c0_9 = arith.constant 0 : index
    %c0_10 = arith.constant 0 : index
    %11 = vector.load %arg5[%c0_9, %c0_10] : memref<1x128xf32, #tpu.memory_space<vmem>>, vector<1x128xf32>
    %12 = vector.broadcast %11 : vector<1x128xf32> to vector<16x128xf32>
    %13 = arith.addf %10, %12 : vector<16x128xf32>
    %c0_11 = arith.constant 0 : index
    %c0_12 = arith.constant 0 : index
    %14 = vector.load %arg6[%c0_11, %c0_12] : memref<16x128xf32, #tpu.memory_space<vmem>>, vector<16x128xf32>
    tpu.vector_store %arg6[%c0_11, %c0_12], %13 {strides = array<i32>} : memref<16x128xf32, #tpu.memory_space<vmem>>, vector<16x128xf32>,
    return
  }
  func.func @transform_0(%arg0: i32) -> (i32, i32) {
    %c0_i32 = arith.constant 0 : i32
    %c0_i32_0 = arith.constant 0 : i32
    return %arg0, %c0_i32 : i32, i32
  }
  func.func @transform_1(%arg0: i32) -> (i32, i32) {
    %c0_i32 = arith.constant 0 : i32
    %c0_i32_0 = arith.constant 0 : i32
    %c0_i32_1 = arith.constant 0 : i32
    return %c0_i32, %c0_i32_0 : i32, i32
  }
  func.func @transform_2(%arg0: i32) -> (i32, i32) {
    %c0_i32 = arith.constant 0 : i32
    %c0_i32_0 = arith.constant 0 : i32
    %c0_i32_1 = arith.constant 0 : i32
    return %c0_i32, %c0_i32_0 : i32, i32
  }
  func.func @transform_3(%arg0: i32) -> (i32, i32) {
    %c0_i32 = arith.constant 0 : i32
    %c0_i32_0 = arith.constant 0 : i32
    %c0_i32_1 = arith.constant 0 : i32
    return %c0_i32, %c0_i32_0 : i32, i32
  }
  func.func @transform_4(%arg0: i32) -> (i32, i32) {
    %c0_i32 = arith.constant 0 : i32
    %c0_i32_0 = arith.constant 0 : i32
    %c0_i32_1 = arith.constant 0 : i32
    return %c0_i32, %c0_i32_0 : i32, i32
  }
  func.func @transform_5(%arg0: i32) -> (i32, i32) {
    %c0_i32 = arith.constant 0 : i32
    %c0_i32_0 = arith.constant 0 : i32
    return %arg0, %c0_i32 : i32, i32
  }
}

</mosaic_0001>

<bundles_post_ra>
// kernel: _mlp_forward_padded.1
= control target key start
LH: loop header
LB: loop body
LE: loop exit
PB: predicated region body
PF: predicated region fallthrough
CT: control target
= control target key end

     0   :  { %10 = vsyncpa [#allocation3], 0  ;;  %s515_s0 = inlined_call_operand.vmem [shape: bf16[16,128], index: 0, kind: input, shape index: {}]   ;;  %s516_s1 = inlined_call_operand.hbm [shape: bf16[128,128], index: 1, kind: input, shape index: {}]   ;;  %s517_s2 = inlined_call_operand.vmem [shape: f32[1,128], index: 2, kind: input, shape index: {}]   ;;  %s518_s3 = inlined_call_operand.hbm [shape: bf16[128,128], index: 3, kind: input, shape index: {}]   ;;  %s519_s4 = inlined_call_operand.vmem [shape: f32[1,128], index: 4, kind: input, shape index: {}]   ;;  %s520_s5 = inlined_call_operand.vmem [shape: f32[16,128], index: 5, kind: output, shape index: {}]  }
   0x1   :  { %11 = vsyncpa [#allocation5], 0  ;;  %s440_s18 = smov [#allocation2]   ;;  %s392_s22 = scalar_lea.hbm %s516_s1, 1024 }
   0x2   :  { %s19_s19 = sshll.u32 %s440_s18, 4  ;;  %p393_p0 = scmp.ne.s32.totalorder %s516_s1, %s392_s22  ;;  %s20_s19 = int_to_ptr.vmem [resolvable:$true] %s19_s19 }
   0x3   :  { %p396_p1 = scmp.lt.u32.totalorder %s392_s22, %s516_s1 }
   0x5   :  { %p398_p2 = pnand %p396_p1, %p393_p0 }
   0x7   :  { %401 = shalt.err (!%p398_p2)
}
   0x8   :  { %s402_s27 = scalar_lea.vmem %s20_s19, 1024  ;;  %p407_p4 = scmp.lt.s32.totalorder %s20_s19, %s20_s19 }
   0x9   :  { %p403_p3 = scmp.ne.s32.totalorder %s20_s19, %s402_s27  ;;  %p408_p5 = scmp.lt.s32.totalorder %s402_s27, %s402_s27 }
   0xb   :  { %p409_p6 = por %p408_p5, %p407_p4 }
   0xd   :  { %p410_p7 = pnand %p409_p6, %p403_p3 }
   0xf   :  { %413 = shalt.err (!%p410_p7)
}
  0x10   :  { %s441_s28 = smov 64   ;;  %s442_s29 = smov 4  }
  0x11   :  { %25 = dma.hbm_to_vmem [thread:$0]  %s516_s1, 1024, %s20_s19, [#allocation3], %s441_s28, %s441_s28, %s442_s29  }
  0x12   :  { %s443_s7 = smov [#allocation4]   ;;  %s414_s11 = scalar_lea.hbm %s518_s3, 1024 }
  0x13   :  { %s33_s8 = sshll.u32 %s443_s7, 4  ;;  %p415_p8 = scmp.ne.s32.totalorder %s518_s3, %s414_s11  ;;  %s34_s8 = int_to_ptr.vmem [resolvable:$true] %s33_s8 }
  0x14   :  { %p418_p9 = scmp.lt.u32.totalorder %s414_s11, %s518_s3 }
  0x16   :  { %p420_p10 = pnand %p418_p9, %p415_p8 }
  0x18   :  { %423 = shalt.err (!%p420_p10)
}
  0x19   :  { %s424_s16 = scalar_lea.vmem %s34_s8, 1024  ;;  %p429_p12 = scmp.lt.s32.totalorder %s34_s8, %s34_s8 }
  0x1a   :  { %p425_p11 = scmp.ne.s32.totalorder %s34_s8, %s424_s16  ;;  %p430_p13 = scmp.lt.s32.totalorder %s424_s16, %s424_s16 }
  0x1c   :  { %p431_p0 = por %p430_p13, %p429_p12 }
  0x1e   :  { %p432_p1 = pnand %p431_p0, %p425_p11 }
  0x20   :  { %435 = shalt.err (!%p432_p1)
}
  0x21   :  { %39 = dma.hbm_to_vmem [thread:$0]  %s518_s3, 1024, %s34_s8, [#allocation5], %s441_s28, %s441_s28, %s442_s29  }
  0x22   :  { %436 = dma.done.wait [#allocation3], 1024  }
  0x23   :  { %437 = vsyncadd [#allocation3], 4294966272 }
  0x24   :  { %438 = dma.done.wait [#allocation5], 1024  }
  0x25   :  { %439 = vsyncadd [#allocation5], 4294966272  ;;  %v444_v0 = vmov 0.0   ;;  %vm445_vm0 = vmmov 0   ;;  %v375_v1 = vld [vmem:[#allocation2] sm:$0xff]   ;;  %v376_v2 = vld [vmem:[#allocation2 + $0x8] sm:$0xff]  }
  0x26   :  { %329 = vmatprep.subr.bf16.mxu0 %v444_v0  ;;  %345 = vmatprep.mubr.msk.bf16.mxu0 %vm445_vm0, %v444_v0  ;;  %v377_v3 = vld [vmem:[#allocation2 + $0x10] sm:$0xff]   ;;  %v384_v4 = vld [vmem:[#allocation4] sm:$0xff]   ;;  %v378_v5 = vld [vmem:[#allocation2 + $0x18] sm:$0xff]  }
  0x27   :  { %349 = vmatprep.subr.bf16.mxu1 %v444_v0  ;;  %365 = vmatprep.mubr.msk.bf16.mxu1 %vm445_vm0, %v444_v0  ;;  %v385_v6 = vld [vmem:[#allocation4 + $0x8] sm:$0xff]   ;;  %v379_v7 = vld [vmem:[#allocation2 + $0x20] sm:$0xff]   ;;  %v386_v8 = vld [vmem:[#allocation4 + $0x10] sm:$0xff]  }
  0x28   :  { %330 = vmatpush3.bf16.msra.mxu0 %v375_v1  ;;  %350 = vmatpush3.bf16.msra.mxu1 %v384_v4  ;;  %v380_v9 = vld [vmem:[#allocation2 + $0x28] sm:$0xff]   ;;  %v387_v10 = vld [vmem:[#allocation4 + $0x18] sm:$0xff]   ;;  %v381_v11 = vld [vmem:[#allocation2 + $0x30] sm:$0xff]  }
  0x29   :  { %331 = vmatprep.subr.bf16.mxu0 %v444_v0  ;;  %351 = vmatprep.subr.bf16.mxu1 %v444_v0  ;;  %v388_v12 = vld [vmem:[#allocation4 + $0x20] sm:$0xff]   ;;  %v382_v13 = vld [vmem:[#allocation2 + $0x38] sm:$0xff]   ;;  %v389_v14 = vld [vmem:[#allocation4 + $0x28] sm:$0xff]  }
  0x2a   :  { %v383_v15 = vld [vmem:[%s515_s0] sm:$0xff]   ;;  %v390_v16 = vld [vmem:[#allocation4 + $0x30] sm:$0xff]   ;;  %v391_v17 = vld [vmem:[#allocation4 + $0x38] sm:$0xff]  }
  0x2b   :  { %v292_v18 = vld [vmem:[%s517_s2] ss:$0 sm:$0xff] }
  0x2c   :  { %332 = vmatpush3.bf16.msra.mxu0 %v376_v2  ;;  %352 = vmatpush3.bf16.msra.mxu1 %v385_v6  ;;  %v302_v28 = vld [vmem:[%s519_s4] ss:$0 sm:$0xff] }
  0x2d   :  { %333 = vmatprep.subr.bf16.mxu0 %v444_v0  ;;  %353 = vmatprep.subr.bf16.mxu1 %v444_v0 }
  0x30   :  { %334 = vmatpush3.bf16.msra.mxu0 %v377_v3  ;;  %354 = vmatpush3.bf16.msra.mxu1 %v386_v8 }
  0x31   :  { %335 = vmatprep.subr.bf16.mxu0 %v444_v0  ;;  %355 = vmatprep.subr.bf16.mxu1 %v444_v0 }
  0x34   :  { %336 = vmatpush3.bf16.msra.mxu0 %v378_v5  ;;  %356 = vmatpush3.bf16.msra.mxu1 %v387_v10 }
  0x35   :  { %337 = vmatprep.subr.bf16.mxu0 %v444_v0  ;;  %357 = vmatprep.subr.bf16.mxu1 %v444_v0 }
  0x38   :  { %338 = vmatpush3.bf16.msra.mxu0 %v379_v7  ;;  %358 = vmatpush3.bf16.msra.mxu1 %v388_v12 }
  0x39   :  { %339 = vmatprep.subr.bf16.mxu0 %v444_v0  ;;  %359 = vmatprep.subr.bf16.mxu1 %v444_v0 }
  0x3c   :  { %340 = vmatpush3.bf16.msra.mxu0 %v380_v9  ;;  %360 = vmatpush3.bf16.msra.mxu1 %v389_v14 }
  0x3d   :  { %341 = vmatprep.subr.bf16.mxu0 %v444_v0  ;;  %361 = vmatprep.subr.bf16.mxu1 %v444_v0 }
  0x40   :  { %342 = vmatpush3.bf16.msra.mxu0 %v381_v11  ;;  %362 = vmatpush3.bf16.msra.mxu1 %v390_v16 }
  0x41   :  { %343 = vmatprep.subr.bf16.mxu0 %v444_v0  ;;  %363 = vmatprep.subr.bf16.mxu1 %v444_v0 }
  0x44   :  { %344 = vmatpush3.bf16.msra.mxu0 %v382_v13  ;;  %364 = vmatpush3.bf16.msra.mxu1 %v391_v17 }
  0x47   :  { %346 = vmatmul.mubr.bf16.vlgmr.msra.gmra.mrb[0].mxu0 %v383_v15 }
 0x11a   :  { %v162_v19 = vpop.f32.mrb[0].mxu0 }
 0x11b   :  { %v163_v20 = vadd.f32 %v292_v18, %v162_v19  ;;  %v347_v21 = vpop.f32.mrb[1].mxu0 }
 0x11c   :  { %v165_v22 = vpop.f32.mrb[2].mxu0 }
 0x11d   :  { %v166_v23 = vadd.f32 %v292_v18, %v165_v22  ;;  %v348_v24 = vpop.f32.mrb[3].mxu0  ;;  %v169_v25 = vmax.f32 %v163_v20, 0.0 }
 0x11f   :  { %v170_v26 = vmax.f32 %v166_v23, 0.0 }
 0x121   :  { %v171_v27 = vpack.c.bf16 %v170_v26, %v169_v25 }
 0x123   :  { %366 = vmatmul.mubr.bf16.vlgmr.msra.gmra.mrb[0].mxu1 %v171_v27 }
 0x1f6   :  { %v277_v29 = vpop.f32.mrb[0].mxu1 }
 0x1f7   :  { %v278_v30 = vadd.f32 %v302_v28, %v277_v29  ;;  %v367_v31 = vpop.f32.mrb[1].mxu1 }
 0x1f8   :  { %v280_v32 = vpop.f32.mrb[2].mxu1 }
 0x1f9   :  { %284 = vst [vmem:[%s520_s5] sm:$0xff] %v278_v30  ;;  %v281_v33 = vadd.f32 %v302_v28, %v280_v32  ;;  %v368_v34 = vpop.f32.mrb[3].mxu1 }
 0x1fb   :  { %285 = vst [vmem:[%s520_s5 + $0x8] sm:$0xff] %v281_v33 }
 0x1fc   :  { %290 = vsyncpa [#allocation3], 1 }
 0x1fd   :  { %291 = vsyncpa [#allocation5], 1 }

</bundles_post_ra>
